<compile_context>
chip_gen: v5e
topology: v5e:2x2
jax: 0.10.0
libtpu: 0.0.40
codegen_flags: <defaults>
</compile_context>

<pallas_src>
import functools

import jax
import jax.numpy as jnp
import numpy as np
from jax.experimental import pallas as pl
from jax.experimental.pallas import tpu as pltpu


# ----------------------------------------------------------------------------- utilities

def pick_n_groups(n_channels):
    assert n_channels % 2 == 0, "n_channels must be even"
    if n_channels % 16 == 0:
        return n_channels // 16
    elif n_channels % 8 == 0:
        return n_channels // 8
    elif n_channels % 4 == 0:
        return n_channels // 4
    return n_channels // 2


def _swish(v, beta):
    # x * sigmoid(beta * x) with an exact sigmoid (accuracy: feeds GN2 statistics).
    return v * (1.0 / (1.0 + jnp.exp(-beta * v)))


def _vmem_limit_bytes():
    # v5e/v6e: 128 MiB physical -> ~96 MiB cap; v7x: 64 MiB -> ~48 MiB cap.
    try:
        cap = pltpu.get_tpu_info().vmem_capacity_bytes
        return int(min(cap * 3 // 4, 100 * 1024 * 1024))
    except Exception:
        return 48 * 1024 * 1024


def _pick_hw_tile(hw, target_px):
    """Largest multiple-of-8 divisor of hw that is <= target_px (fallbacks keep us legal)."""
    divs = [d for d in range(8, hw + 1, 8) if hw % d == 0]
    if not divs:
        return hw                      # tile == full dim is always a legal block shape
    fits = [d for d in divs if d <= target_px]
    return max(fits) if fits else min(divs)


def _largest_divisor_leq(n, cap):
    cap = max(1, min(n, cap))
    for d in range(cap, 0, -1):
        if n % d == 0:
            return d
    return 1


def _group_affine(mean_c, var_c, gamma, beta_p, n_groups, eps=1e-5):
    """Per-channel (mean, var) -> per-channel GroupNorm affine (scale, shift). All f32."""
    b, c = mean_c.shape
    cs = c // n_groups
    mg = mean_c.reshape(b, n_groups, cs)
    mean_g = mg.mean(-1)                                              # (B, G)
    # group var = mean of per-channel vars + var of per-channel means (less cancellation)
    var_g = (var_c.reshape(b, n_groups, cs).mean(-1)
             + ((mg - mean_g[..., None]) ** 2).mean(-1))
    inv_c = jnp.repeat(jax.lax.rsqrt(var_g + eps), cs, axis=1)        # (B, C)
    mean_cb = jnp.repeat(mean_g, cs, axis=1)
    scale = inv_c * gamma[None, :]
    shift = beta_p[None, :] - mean_cb * scale
    return scale, shift


# ----------------------------------------------------------------------------- kernels

def _x_moments_kernel(x_ref, s_ref, q_ref):
    """Accumulate per-channel sum(x), sum(x^2) over HW tiles (pass 1)."""
    it = pl.program_id(1)

    @pl.when(it == 0)
    def _init():
        s_ref[...] = jnp.zeros_like(s_ref)
        q_ref[...] = jnp.zeros_like(q_ref)

    x = x_ref[...].astype(jnp.float32)                                # (bt, tile, Cin)
    s_ref[...] += jnp.sum(x, axis=1, keepdims=True)
    q_ref[...] += jnp.sum(x * x, axis=1, keepdims=True)


def _f_moments_kernel(x_ref, sc_ref, sh_ref, s_ref, q_ref, *, beta):
    """Accumulate per-channel sum(f), sum(f^2) where f = swish(GN1(x)) (pass 2)."""
    it = pl.program_id(1)

    @pl.when(it == 0)
    def _init():
        s_ref[...] = jnp.zeros_like(s_ref)
        q_ref[...] = jnp.zeros_like(q_ref)

    x = x_ref[...].astype(jnp.float32)                                # (bt, tile, Cin)
    f = _swish(x * sc_ref[...] + sh_ref[...], beta)                   # (bt, tile, Cin)
    s_ref[...] += jnp.sum(f, axis=1, keepdims=True)
    q_ref[...] += jnp.sum(f * f, axis=1, keepdims=True)


def _apply_kernel(x_ref, sc_ref, sh_ref, a_ref, c_ref, w_ref, bp_ref, out_ref, *, beta):
    """Pass 3: recompute f, depthwise-expand + GN2 + Swish as a per-(p,m,c) affine,
    pointwise 1x1 conv as an M-stacked, K-split (over m) matmul, lane-dense store."""
    bt, tile, cin = x_ref.shape
    kpl = a_ref.shape[2]
    coutp = out_ref.shape[-1]
    m_rows = bt * 4 * tile

    x = x_ref[...].astype(jnp.float32)                                # (bt, tile, Cin)
    f = _swish(x * sc_ref[...] + sh_ref[...], beta)                   # (bt, tile, Cin)
    f4 = f[:, None, :, :]                                             # (bt, 1, tile, Cin)

    a = a_ref[...]                                                    # (bt, 4, kpl, Cin)
    c = c_ref[...]                                                    # (bt, kpl, Cin)

    acc = jnp.zeros((m_rows, coutp), jnp.float32)
    for m in range(kpl):                                              # static unroll (K-split)
        a_m = a[:, :, m, :][:, :, None, :]                            # (bt, 4, 1, Cin)
        c_m = c[:, m, :][:, None, None, :]                            # (bt, 1, 1, Cin)
        h = _swish(f4 * a_m + c_m, beta)                              # (bt, 4, tile, Cin)
        # all 4 slots share the RHS -> one larger-M matmul per m-slice (f32 accumulate)
        acc = acc + jnp.dot(h.reshape(m_rows, cin), w_ref[m],
                            preferred_element_type=jnp.float32)
    acc = acc + bp_ref[...]                                           # (1, coutp) broadcast

    out_ref[...] = acc.reshape(bt, 4, tile, coutp).astype(out_ref.dtype)


# ----------------------------------------------------------------------------- wrapper

def upsample_unit_forward(x_nchw, params, beta=1.0, h_pad=False, w_pad=False, *,
                          tile_hw=None, batch_block=None, out_dtype=jnp.bfloat16):
    """x_nchw: (B, Cin, H, W) float32. Returns (B, Cout, 2H, 2W) (minus pad slices).

    out_dtype defaults to bfloat16 (halves the dominant HBM writeback); pass
    jnp.float32 for bit-closer parity with the f32 reference.
    """
    B, Cin, H, W = x_nchw.shape
    wd = params["wd"]                      # (Cin, kpl, 2, 2) ConvTranspose2d weight
    bd = params["bd"].astype(jnp.float32)  # (Cmid,)
    wp = params["wp"]                      # (Cout, Cmid) 1x1 conv weight
    bp = params["bp"].astype(jnp.float32)  # (Cout,)
    gamma1 = params["gamma1"].astype(jnp.float32)
    beta1 = params["beta1"].astype(jnp.float32)
    gamma2 = params["gamma2"].astype(jnp.float32)
    beta2 = params["beta2"].astype(jnp.float32)

    kpl = wd.shape[1]
    Cmid = Cin * kpl
    Cout = wp.shape[0]
    HW = H * W
    g1n = pick_n_groups(Cin)
    g2n = pick_n_groups(Cmid)

    # --- optional Cout padding: lane-dense unmasked stores, only if inflation <= 1.5x ---
    coutp = Cout
    if Cout % 128 != 0:
        padded = ((Cout + 127) // 128) * 128
        if 2 * padded <= 3 * Cout:
            coutp = padded

    # --- tile sizing from the per-chip VMEM budget ---
    vmem_limit = _vmem_limit_bytes()
    out_bytes = np.dtype(out_dtype).itemsize
    per_px = 4 * (6 * Cin + 4 * coutp) + 2 * (4 * Cin + 4 * coutp * out_bytes)
    target_px = max(8, int((vmem_limit // 3) // max(per_px, 1)))
    tile = int(tile_hw) if tile_hw else _pick_hw_tile(HW, target_px)
    bt = int(batch_block) if batch_block else _largest_divisor_leq(B, max(1, target_px // tile))
    assert HW % tile == 0, f"tile_hw={tile} must divide H*W={HW}"
    assert B % bt == 0, f"batch_block={bt} must divide B={B}"
    nb, nt = B // bt, HW // tile

    cp_stats = pltpu.CompilerParams(dimension_semantics=("parallel", "arbitrary"),
                                    vmem_limit_bytes=vmem_limit)
    cp_apply = pltpu.CompilerParams(dimension_semantics=("parallel", "parallel"),
                                    vmem_limit_bytes=vmem_limit)
    sds = jax.ShapeDtypeStruct

    # --- layout: NCHW -> pixel-major (B, HW, Cin) ---
    x_l = jnp.transpose(x_nchw, (0, 2, 3, 1)).reshape(B, HW, Cin).astype(jnp.float32)

    x_spec = pl.BlockSpec((bt, tile, Cin), lambda ib, it: (ib, it, 0))
    chan_acc_spec = pl.BlockSpec((bt, 1, Cin), lambda ib, it: (ib, 0, 0))

    # ---------------- pass 1: sums of x, x^2 -> GN1 affine (glue) ----------------
    s1o, q1o = pl.pallas_call(
        _x_moments_kernel,
        out_shape=(sds((B, 1, Cin), jnp.float32), sds((B, 1, Cin), jnp.float32)),
        grid=(nb, nt),
        in_specs=[x_spec],
        out_specs=(chan_acc_spec, chan_acc_spec),
        compiler_params=cp_stats,
    )(x_l)
    s1, sq1 = s1o[:, 0, :], q1o[:, 0, :]                              # (B, Cin)

    mean1 = s1 / HW
    var1 = jnp.maximum(sq1 / HW - mean1 * mean1, 0.0)
    scale1, shift1 = _group_affine(mean1, var1, gamma1, beta1, g1n)   # (B, Cin)
    sc1 = scale1[:, None, :]                                          # (B, 1, Cin)
    sh1 = shift1[:, None, :]

    # ---------------- pass 2: sums of f, f^2 -> GN2 affine in CLOSED FORM (glue) --------
    sfo, sqfo = pl.pallas_call(
        functools.partial(_f_moments_kernel, beta=float(beta)),
        out_shape=(sds((B, 1, Cin), jnp.float32), sds((B, 1, Cin), jnp.float32)),
        grid=(nb, nt),
        in_specs=[x_spec,
                  pl.BlockSpec((bt, 1, Cin), lambda ib, it: (ib, 0, 0)),
                  pl.BlockSpec((bt, 1, Cin), lambda ib, it: (ib, 0, 0))],
        out_specs=(chan_acc_spec, chan_acc_spec),
        compiler_params=cp_stats,
    )(x_l, sc1, sh1)
    sf, sqf = sfo[:, 0, :], sqfo[:, 0, :]                             # (B, Cin)

    # depthwise output g[b, c*kpl+m, :, :] = f[b, c]*wd[c, m, ki, kj] + bd  (stride-2, k=2)
    wsum_pt = jnp.sum(wd, axis=(2, 3)).reshape(Cmid).astype(jnp.float32)    # PyTorch order
    wsq_pt = jnp.sum(wd * wd, axis=(2, 3)).reshape(Cmid).astype(jnp.float32)
    sf_mid = jnp.repeat(sf, kpl, axis=1)                              # (B, Cmid)
    sqf_mid = jnp.repeat(sqf, kpl, axis=1)
    npix = 4.0 * HW
    mu_u = wsum_pt[None, :] * sf_mid / npix                           # E[w*f] per mid-channel
    mean2c = mu_u + bd[None, :]                                       # bias shift (exact)
    var2c = jnp.maximum(wsq_pt[None, :] * sqf_mid / npix - mu_u * mu_u, 0.0)
    scale2, shift2 = _group_affine(mean2c, var2c, gamma2, beta2, g2n)  # (B, Cmid)

    # fold GN2 + depthwise weight into per-(slot p, m, channel) affine rows (m-major)
    wd_pmc = jnp.transpose(wd, (2, 3, 1, 0)).reshape(4, kpl, Cin).astype(jnp.float32)
    scale2_mc = jnp.transpose(scale2.reshape(B, Cin, kpl), (0, 2, 1))  # (B, kpl, Cin)
    arows = wd_pmc[None, :, :, :] * scale2_mc[:, None, :, :]           # (B, 4, kpl, Cin)
    cconst = jnp.transpose((bd[None, :] * scale2 + shift2).reshape(B, Cin, kpl),
                           (0, 2, 1))                                  # (B, kpl, Cin)

    wp_r = jnp.transpose(wp.T.reshape(Cin, kpl, Cout), (1, 0, 2)).astype(jnp.float32)
    bp_p = bp
    if coutp != Cout:
        wp_r = jnp.pad(wp_r, ((0, 0), (0, 0), (0, coutp - Cout)))
        bp_p = jnp.pad(bp, (0, coutp - Cout))
    bp2 = bp_p.reshape(1, coutp)

    # ---------------- pass 3: apply (expand + GN2 + Swish + pointwise) ----------------
    out4 = pl.pallas_call(
        functools.partial(_apply_kernel, beta=float(beta)),
        out_shape=sds((B, 4, HW, coutp), out_dtype),
        grid=(nb, nt),
        in_specs=[
            x_spec,
            pl.BlockSpec((bt, 1, Cin), lambda ib, it: (ib, 0, 0)),     # scale1
            pl.BlockSpec((bt, 1, Cin), lambda ib, it: (ib, 0, 0)),     # shift1
            pl.BlockSpec((bt, 4, kpl, Cin), lambda ib, it: (ib, 0, 0, 0)),   # a rows
            pl.BlockSpec((bt, kpl, Cin), lambda ib, it: (ib, 0, 0)),   # slot-constant rows
            pl.BlockSpec((kpl, Cin, coutp), lambda ib, it: (0, 0, 0)),  # Wp (m, c, o)
            pl.BlockSpec((1, coutp), lambda ib, it: (0, 0)),           # bp
        ],
        out_specs=pl.BlockSpec((bt, 4, tile, coutp), lambda ib, it: (ib, 0, it, 0)),
        compiler_params=cp_apply,
    )(x_l, sc1, sh1, arows, cconst, wp_r, bp2)

    # ---------------- glue: (B, 4, HW, Coutp) -> NCHW (B, Cout, 2H, 2W) ----------------
    out4 = out4[..., :Cout]
    out = out4.reshape(B, 2, 2, H, W, Cout)                 # (b, ki, kj, h, w, o)
    out = jnp.transpose(out, (0, 5, 3, 1, 4, 2))            # (b, o, h, ki, w, kj)
    out = out.reshape(B, Cout, 2 * H, 2 * W)
    if h_pad:
        out = out[:, :, :-1, :]
    if w_pad:
        out = out[:, :, :, :-1]
    return out


# ----------------------------------------------------------------------------- reference

def _reference_forward(x, params, beta=1.0):
    """Pure-JAX (f32) reference mirroring the PyTorch forward (NCHW), for validation."""
    def group_norm(v, num_groups, gamma, bias, eps=1e-5):
        N, C, H, W = v.shape
        vg = v.reshape(N, num_groups, C // num_groups, H, W)
        mean = vg.mean(axis=(2, 3, 4), keepdims=True)
        var = vg.var(axis=(2, 3, 4), keepdims=True)
        vn = ((vg - mean) / jnp.sqrt(var + eps)).reshape(N, C, H, W)
        return vn * gamma[None, :, None, None] + bias[None, :, None, None]

    wd, bd, wp, bp = params["wd"], params["bd"], params["wp"], params["bp"]
    Cin, kpl = wd.shape[0], wd.shape[1]
    f = group_norm(x, pick_n_groups(Cin), params["gamma1"], params["beta1"])
    f = f * jax.nn.sigmoid(beta * f)
    N, C, H, W = f.shape
    g = jnp.einsum("nchw,cmij->ncmhiwj", f, wd).reshape(N, C * kpl, 2 * H, 2 * W)
    g = g + bd[None, :, None, None]
    g = group_norm(g, pick_n_groups(C * kpl), params["gamma2"], params["beta2"])
    g = g * jax.nn.sigmoid(beta * g)
    return jnp.einsum("nchw,oc->nohw", g, wp) + bp[None, :, None, None]


# ----------------------------------------------------------------------------- test

if __name__ == "__main__":
    B, Cin, H, W = 2, 16, 8, 8
    kpl, Cout = 4, 16
    Cmid = Cin * kpl

    key = jax.random.PRNGKey(0)
    k_x, k_wd, k_wp, k_bd, k_bp = jax.random.split(key, 5)

    x = jax.random.normal(k_x, (B, Cin, H, W), dtype=jnp.float32)

    # kaiming_normal-style deterministic init for conv weights; GN affine defaults.
    wd = jax.random.normal(k_wd, (Cin, kpl, 2, 2), jnp.float32) * np.sqrt(2.0 / (kpl * 4))
    wp = jax.random.normal(k_wp, (Cout, Cmid), jnp.float32) * np.sqrt(2.0 / Cmid)
    params = {
        "wd": wd,
        "bd": 0.1 * jax.random.normal(k_bd, (Cmid,), jnp.float32),
        "wp": wp,
        "bp": 0.1 * jax.random.normal(k_bp, (Cout,), jnp.float32),
        "gamma1": jnp.ones((Cin,), jnp.float32),
        "beta1": jnp.zeros((Cin,), jnp.float32),
        "gamma2": jnp.ones((Cmid,), jnp.float32),
        "beta2": jnp.zeros((Cmid,), jnp.float32),
    }

    ref = jax.block_until_ready(_reference_forward(x, params, beta=1.0))

    # Config A: auto tiling (whole-image tile, batched grid step), bf16 output.
    out_a = upsample_unit_forward(x, params, beta=1.0)
    out_a = jax.block_until_ready(out_a)
    assert out_a.shape == (B, Cout, 2 * H, 2 * W), out_a.shape
    np.testing.assert_allclose(np.asarray(out_a.astype(jnp.float32)), np.asarray(ref),
                               rtol=1e-2, atol=1e-2)

    # Config B: forced small HW tiles + single batch element per step (exercises the
    # multi-tile stats accumulation and multi-block output path), f32 output.
    out_b = upsample_unit_forward(x, params, beta=1.0, tile_hw=16, batch_block=1,
                                  out_dtype=jnp.float32)
    out_b = jax.block_until_ready(out_b)
    np.testing.assert_allclose(np.asarray(out_b), np.asarray(ref), rtol=1e-2, atol=1e-2)

    print("KERNEL_OK")
</pallas_src>

<mosaic_0001>
module attributes {stable_mosaic.version = 11 : i64} {
  func.func @_x_moments_kernel(%arg0: i32, %arg1: i32, %arg2: memref<2x64x16xf32, #tpu.memory_space<vmem>>, %arg3: memref<2x1x16xf32, #tpu.memory_space<vmem>>, %arg4: memref<2x1x16xf32, #tpu.memory_space<vmem>>) attributes {dimension_semantics = [#tpu.dimension_semantics<parallel>, #tpu.dimension_semantics<arbitrary>], iteration_bounds = array<i64: 1, 1>, scalar_prefetch = 0 : i64, scratch_operands = 0 : i64, tpu.core_type = #tpu.core_type<tc>, window_params = [{transform_indices = @transform_0, window_bounds = array<i64: 2, 64, 16>}, {transform_indices = @transform_1, window_bounds = array<i64: 2, 1, 16>}, {transform_indices = @transform_2, window_bounds = array<i64: 2, 1, 16>}]} {
    %c0_i32 = arith.constant 0 : i32
    %0 = arith.cmpi eq, %arg1, %c0_i32 : i32
    %1 = arith.extui %0 : i1 to i32
    %c0_i32_0 = arith.constant 0 : i32
    %2 = arith.cmpi ne, %1, %c0_i32_0 : i32
    scf.if %2 {
      %cst_16 = arith.constant 0.000000e+00 : f32
      %15 = vector.broadcast %cst_16 : f32 to vector<2x1x16xf32>
      %c0_17 = arith.constant 0 : index
      %c0_18 = arith.constant 0 : index
      %c0_19 = arith.constant 0 : index
      %16 = vector.load %arg3[%c0_17, %c0_18, %c0_19] : memref<2x1x16xf32, #tpu.memory_space<vmem>>, vector<2x1x16xf32>
      tpu.vector_store %arg3[%c0_17, %c0_18, %c0_19], %15 {strides = array<i32>} : memref<2x1x16xf32, #tpu.memory_space<vmem>>, vector<2x1x16xf32>,
      %cst_20 = arith.constant 0.000000e+00 : f32
      %17 = vector.broadcast %cst_20 : f32 to vector<2x1x16xf32>
      %c0_21 = arith.constant 0 : index
      %c0_22 = arith.constant 0 : index
      %c0_23 = arith.constant 0 : index
      %18 = vector.load %arg4[%c0_21, %c0_22, %c0_23] : memref<2x1x16xf32, #tpu.memory_space<vmem>>, vector<2x1x16xf32>
      tpu.vector_store %arg4[%c0_21, %c0_22, %c0_23], %17 {strides = array<i32>} : memref<2x1x16xf32, #tpu.memory_space<vmem>>, vector<2x1x16xf32>,
    } else {
    }
    %c0 = arith.constant 0 : index
    %c0_1 = arith.constant 0 : index
    %c0_2 = arith.constant 0 : index
    %3 = vector.load %arg2[%c0, %c0_1, %c0_2] : memref<2x64x16xf32, #tpu.memory_space<vmem>>, vector<2x64x16xf32>
    %c0_3 = arith.constant 0 : index
    %c0_4 = arith.constant 0 : index
    %c0_5 = arith.constant 0 : index
    %4 = vector.load %arg3[%c0_3, %c0_4, %c0_5] : memref<2x1x16xf32, #tpu.memory_space<vmem>>, vector<2x1x16xf32>
    %cst = arith.constant dense<0.000000e+00> : vector<2x16xf32>
    %5 = vector.multi_reduction <add>, %3, %cst [1] : vector<2x64x16xf32> to vector<2x16xf32>
    %6 = vector.shape_cast %5 : vector<2x16xf32> to vector<2x1x16xf32>
    %7 = arith.addf %4, %6 : vector<2x1x16xf32>
    %c0_6 = arith.constant 0 : index
    %c0_7 = arith.constant 0 : index
    %c0_8 = arith.constant 0 : index
    %8 = vector.load %arg3[%c0_6, %c0_7, %c0_8] : memref<2x1x16xf32, #tpu.memory_space<vmem>>, vector<2x1x16xf32>
    tpu.vector_store %arg3[%c0_6, %c0_7, %c0_8], %7 {strides = array<i32>} : memref<2x1x16xf32, #tpu.memory_space<vmem>>, vector<2x1x16xf32>,
    %c0_9 = arith.constant 0 : index
    %c0_10 = arith.constant 0 : index
    %c0_11 = arith.constant 0 : index
    %9 = vector.load %arg4[%c0_9, %c0_10, %c0_11] : memref<2x1x16xf32, #tpu.memory_space<vmem>>, vector<2x1x16xf32>
    %10 = arith.mulf %3, %3 : vector<2x64x16xf32>
    %cst_12 = arith.constant dense<0.000000e+00> : vector<2x16xf32>
    %11 = vector.multi_reduction <add>, %10, %cst_12 [1] : vector<2x64x16xf32> to vector<2x16xf32>
    %12 = vector.shape_cast %11 : vector<2x16xf32> to vector<2x1x16xf32>
    %13 = arith.addf %9, %12 : vector<2x1x16xf32>
    %c0_13 = arith.constant 0 : index
    %c0_14 = arith.constant 0 : index
    %c0_15 = arith.constant 0 : index
    %14 = vector.load %arg4[%c0_13, %c0_14, %c0_15] : memref<2x1x16xf32, #tpu.memory_space<vmem>>, vector<2x1x16xf32>
    tpu.vector_store %arg4[%c0_13, %c0_14, %c0_15], %13 {strides = array<i32>} : memref<2x1x16xf32, #tpu.memory_space<vmem>>, vector<2x1x16xf32>,
    return
  }
  func.func @transform_0(%arg0: i32, %arg1: i32) -> (i32, i32, i32) {
    %c0_i32 = arith.constant 0 : i32
    %c0_i32_0 = arith.constant 0 : i32
    return %arg0, %arg1, %c0_i32 : i32, i32, i32
  }
  func.func @transform_1(%arg0: i32, %arg1: i32) -> (i32, i32, i32) {
    %c0_i32 = arith.constant 0 : i32
    %c0_i32_0 = arith.constant 0 : i32
    %c0_i32_1 = arith.constant 0 : i32
    return %arg0, %c0_i32, %c0_i32_0 : i32, i32, i32
  }
  func.func @transform_2(%arg0: i32, %arg1: i32) -> (i32, i32, i32) {
    %c0_i32 = arith.constant 0 : i32
    %c0_i32_0 = arith.constant 0 : i32
    %c0_i32_1 = arith.constant 0 : i32
    return %arg0, %c0_i32, %c0_i32_0 : i32, i32, i32
  }
}

</mosaic_0001>

<bundles_post_ra>
// kernel: tpu_custom_call.1
= control target key start
LH: loop header
LB: loop body
LE: loop exit
PB: predicated region body
PF: predicated region fallthrough
CT: control target
= control target key end

     0   :  { %8 = vsyncpa [#allocation3], 0  ;;  %vm16_vm0 = vcmask 122880   ;;  %vm39_vm1 = vcmask 130048   ;;  %v244_v2 = vmov 0.0   ;;  %s358_s0 = inlined_call_operand.vmem [shape: f32[2,64,16], index: 0, kind: input, shape index: {}]   ;;  %s359_s1 = inlined_call_operand.hbm [shape: f32[2,1,16], index: 1, kind: output, shape index: {0}]   ;;  %s360_s2 = inlined_call_operand.hbm [shape: f32[2,1,16], index: 2, kind: output, shape index: {1}]  }
   0x1   :  { %v21_v0 = vld [vmem:[%s358_s0] sm:$0xff]  ;;  %v22_v1 = vld [vmem:[%s358_s0 + $0x8] sm:$0xff]  ;;  %17 = vst.msk [vmem:[#allocation2] sm:$0x1] %vm16_vm0, %v244_v2  ;;  %v23_v3 = vld [vmem:[%s358_s0 + $0x10] sm:$0xff] }
   0x2   :  { %v24_v4 = vld [vmem:[%s358_s0 + $0x18] sm:$0xff]  ;;  %v25_v5 = vld [vmem:[%s358_s0 + $0x20] sm:$0xff]  ;;  %v40_v6 = vsel %vm39_vm1, %v21_v0, 0.0  ;;  %18 = vst.msk [vmem:[#allocation2 + $0x1] sm:$0x1] %vm16_vm0, %v244_v2  ;;  %v41_v7 = vsel %vm39_vm1, %v22_v1, 0.0  ;;  %v89_v13 = vmul.f32 %v21_v0, %v21_v0  ;;  %v90_v14 = vmul.f32 %v22_v1, %v22_v1 }
   0x3   :  { %v43_v8 = vsel %vm39_vm1, %v23_v3, 0.0  ;;  %19 = vst.msk [vmem:[#allocation4] sm:$0x1] %vm16_vm0, %v244_v2  ;;  %v26_v9 = vld [vmem:[%s358_s0 + $0x28] sm:$0xff]  ;;  %v27_v10 = vld [vmem:[%s358_s0 + $0x30] sm:$0xff]  ;;  %v42_v11 = vadd.f32 %v41_v7, %v40_v6  ;;  %v45_v12 = vsel %vm39_vm1, %v24_v4, 0.0  ;;  %v91_v19 = vmul.f32 %v23_v3, %v23_v3 }
   0x4   :  { %20 = vst.msk [vmem:[#allocation4 + $0x1] sm:$0x1] %vm16_vm0, %v244_v2  ;;  %v47_v15 = vsel %vm39_vm1, %v25_v5, 0.0  ;;  %v29_v16 = vld [vmem:[%s358_s0 + $0x40] sm:$0xff]  ;;  %v30_v17 = vld [vmem:[%s358_s0 + $0x48] sm:$0xff]  ;;  %v31_v18 = vld [vmem:[%s358_s0 + $0x50] sm:$0xff]  ;;  %v92_v20 = vmul.f32 %v24_v4, %v24_v4  ;;  %v93_v21 = vmul.f32 %v25_v5, %v25_v5  ;;  %v94_v34 = vmul.f32 %v26_v9, %v26_v9 }
   0x5   :  { %v28_v22 = vld [vmem:[%s358_s0 + $0x38] sm:$0xff]  ;;  %v44_v23 = vadd.f32 %v43_v8, %v42_v11  ;;  %v61_v24 = vsel %vm39_vm1, %v29_v16, 0.0  ;;  %v62_v25 = vsel %vm39_vm1, %v30_v17, 0.0  ;;  %v64_v26 = vsel %vm39_vm1, %v31_v18, 0.0 }
   0x6   :  { %v49_v27 = vsel %vm39_vm1, %v26_v9, 0.0  ;;  %v51_v28 = vsel %vm39_vm1, %v27_v10, 0.0  ;;  %v53_v29 = vsel %vm39_vm1, %v28_v22, 0.0  ;;  %v32_v30 = vld [vmem:[%s358_s0 + $0x58] sm:$0xff]  ;;  %v63_v31 = vadd.f32 %v62_v25, %v61_v24 }
   0x7   :  { %v46_v32 = vadd.f32 %v45_v12, %v44_v23  ;;  %v66_v33 = vsel %vm39_vm1, %v32_v30, 0.0  ;;  %v95_v35 = vmul.f32 %v27_v10, %v27_v10 }
   0x8   :  { %9 = vsyncpa [#allocation5], 0  ;;  %v33_v36 = vld [vmem:[%s358_s0 + $0x60] sm:$0xff]  ;;  %v34_v37 = vld [vmem:[%s358_s0 + $0x68] sm:$0xff]  ;;  %v65_v38 = vadd.f32 %v64_v26, %v63_v31  ;;  %v105_v39 = vsel %vm39_vm1, %v89_v13, 0.0  ;;  %v106_v40 = vsel %vm39_vm1, %v90_v14, 0.0  ;;  %v97_v54 = vmul.f32 %v29_v16, %v29_v16 }
   0x9   :  { %v108_v41 = vsel %vm39_vm1, %v91_v19, 0.0  ;;  %v48_v42 = vadd.f32 %v47_v15, %v46_v32  ;;  %v35_v43 = vld [vmem:[%s358_s0 + $0x70] sm:$0xff]  ;;  %v36_v44 = vld [vmem:[%s358_s0 + $0x78] sm:$0xff]  ;;  %v68_v45 = vsel %vm39_vm1, %v33_v36, 0.0  ;;  %v70_v46 = vsel %vm39_vm1, %v34_v37, 0.0  ;;  %s245_s0 = smov [#allocation2]  }
   0xa   :  { %v107_v47 = vadd.f32 %v106_v40, %v105_v39  ;;  %v67_v48 = vadd.f32 %v66_v33, %v65_v38  ;;  %v72_v49 = vsel %vm39_vm1, %v35_v43, 0.0  ;;  %v74_v50 = vsel %vm39_vm1, %v36_v44, 0.0  ;;  %v37_v38 = vld [vmem:[#allocation2] sm:$0x1]  ;;  %s155_s13 = sshll.u32 %s245_s0, 4  ;;  %s157_s16 = sshll.u32 %s359_s1, 4  ;;  %s156_s13 = int_to_ptr.vmem [resolvable:$true] %s155_s13  ;;  %s158_s16 = int_to_ptr.hbm [resolvable:$true] %s157_s16 }
   0xb   :  { %v110_v51 = vsel %vm39_vm1, %v92_v20, 0.0  ;;  %v50_v52 = vadd.f32 %v49_v27, %v48_v42  ;;  %v98_v55 = vmul.f32 %v30_v17, %v30_v17  ;;  %v112_v57 = vsel %vm39_vm1, %v93_v21, 0.0  ;;  %s246_s1 = smov 16   ;;  %s247_s17 = smov 1  }
   0xc   :  { %v109_v53 = vadd.f32 %v108_v41, %v107_v47  ;;  %v69_v56 = vadd.f32 %v68_v45, %v67_v48  ;;  %v99_v58 = vmul.f32 %v31_v18, %v31_v18  ;;  %v100_v59 = vmul.f32 %v32_v30, %v32_v30  ;;  %v38_v45 = vld [vmem:[#allocation2 + $0x1] sm:$0x1]  ;;  %s248_s18 = smov [#allocation4]   ;;  %s170_s22 = sshll.u32 %s360_s2, 4  ;;  %s171_s22 = int_to_ptr.hbm [resolvable:$true] %s170_s22 }
   0xd   :  { %v52_v60 = vadd.f32 %v51_v28, %v50_v52  ;;  %v96_v61 = vmul.f32 %v28_v22, %v28_v22  ;;  %v114_v63 = vsel %vm39_vm1, %v94_v34, 0.0  ;;  %v101_v1 = vmul.f32 %v33_v36, %v33_v36  ;;  %v87_v52 = vld [vmem:[#allocation4] sm:$0x1]  ;;  %s168_s19 = sshll.u32 %s248_s18, 4  ;;  %s169_s19 = int_to_ptr.vmem [resolvable:$true] %s168_s19 }
   0xe   :  { %v111_v62 = vadd.f32 %v110_v51, %v109_v53  ;;  %v71_v0 = vadd.f32 %v70_v46, %v69_v56  ;;  %v126_v2 = vsel %vm39_vm1, %v97_v54, 0.0  ;;  %v127_v3 = vsel %vm39_vm1, %v98_v55, 0.0 }
   0xf   :  { %v54_v4 = vadd.f32 %v53_v29, %v52_v60  ;;  %v128_v6 = vadd.f32 %v127_v3, %v126_v2  ;;  %v129_v7 = vsel %vm39_vm1, %v99_v58, 0.0  ;;  %v116_v9 = vsel %vm39_vm1, %v95_v35, 0.0  ;;  %v88_v58 = vld [vmem:[#allocation4 + $0x1] sm:$0x1] }
  0x10   :  { %v113_v5 = vadd.f32 %v112_v57, %v111_v62  ;;  %v73_v8 = vadd.f32 %v72_v49, %v71_v0  ;;  %v102_v10 = vmul.f32 %v34_v37, %v34_v37  ;;  %v131_v11 = vsel %vm39_vm1, %v100_v59, 0.0 }
  0x11   :  { %v55_v12 = vrot.slane %v54_v4, 4  ;;  %v130_v14 = vadd.f32 %v129_v7, %v128_v6  ;;  %v118_v16 = vsel %vm39_vm1, %v96_v61, 0.0  ;;  %v103_v17 = vmul.f32 %v35_v43, %v35_v43 }
  0x12   :  { %v115_v13 = vadd.f32 %v114_v63, %v113_v5  ;;  %v75_v15 = vadd.f32 %v74_v50, %v73_v8  ;;  %v133_v18 = vsel %vm39_vm1, %v101_v1, 0.0  ;;  %v104_v23 = vmul.f32 %v36_v44, %v36_v44 }
  0x13   :  { %v56_v19 = vadd.f32 %v55_v12, %v54_v4  ;;  %v132_v21 = vadd.f32 %v131_v11, %v130_v14  ;;  %v135_v24 = vsel %vm39_vm1, %v102_v10, 0.0  ;;  %v137_v29 = vsel %vm39_vm1, %v103_v17, 0.0 }
  0x14   :  { %v117_v20 = vadd.f32 %v116_v9, %v115_v13  ;;  %v76_v22 = vrot.slane %v75_v15, 4  ;;  %v139_v34 = vsel %vm39_vm1, %v104_v23, 0.0 }
  0x15   :  { %v57_v25 = vrot.slane %v56_v19, 2  ;;  %v134_v27 = vadd.f32 %v133_v18, %v132_v21 }
  0x16   :  { %v119_v26 = vadd.f32 %v118_v16, %v117_v20  ;;  %v77_v28 = vadd.f32 %v76_v22, %v75_v15 }
  0x17   :  { %v58_v30 = vadd.f32 %v57_v25, %v56_v19  ;;  %v136_v32 = vadd.f32 %v135_v24, %v134_v27 }
  0x18   :  { %v120_v31 = vrot.slane %v119_v26, 4  ;;  %v78_v33 = vrot.slane %v77_v28, 2 }
  0x19   :  { %v59_v35 = vrot.slane %v58_v30, 1  ;;  %v138_v37 = vadd.f32 %v137_v29, %v136_v32 }
  0x1a   :  { %v121_v36 = vadd.f32 %v120_v31, %v119_v26  ;;  %v79_v39 = vadd.f32 %v78_v33, %v77_v28 }
  0x1b   :  { %v60_v40 = vadd.f32 %v59_v35, %v58_v30  ;;  %v140_v42 = vadd.f32 %v139_v34, %v138_v37 }
  0x1c   :  { %v122_v41 = vrot.slane %v121_v36, 2  ;;  %v80_v43 = vrot.slane %v79_v39, 1 }
  0x1d   :  { %v82_v44 = vadd.f32 %v60_v40, %v37_v38  ;;  %v141_v47 = vrot.slane %v140_v42, 4 }
  0x1e   :  { %v123_v46 = vadd.f32 %v122_v41, %v121_v36  ;;  %v81_v48 = vadd.f32 %v80_v43, %v79_v39 }
  0x1f   :  { %85 = vst.msk [vmem:[#allocation2] sm:$0x1] %vm16_vm0, %v82_v44  ;;  %v142_v50 = vadd.f32 %v141_v47, %v140_v42 }
  0x20   :  { %v124_v49 = vrot.slane %v123_v46, 1  ;;  %v83_v51 = vadd.f32 %v81_v48, %v38_v45 }
  0x21   :  { %v143_v54 = vrot.slane %v142_v50, 2 }
  0x22   :  { %v125_v53 = vadd.f32 %v124_v49, %v123_v46  ;;  %86 = vst.msk [vmem:[#allocation2 + $0x1] sm:$0x1] %vm16_vm0, %v83_v51 }
  0x23   :  { %v144_v56 = vadd.f32 %v143_v54, %v142_v50  ;;  %163 = dma.vmem_to_hbm [thread:$0]  %s156_s13, 32, %s158_s16, [#allocation3], %s246_s1, %s246_s1, %s247_s17  }
  0x24   :  { %v147_v55 = vadd.f32 %v125_v53, %v87_v52 }
  0x25   :  { %v145_v57 = vrot.slane %v144_v56, 1 }
  0x26   :  { %149 = vst.msk [vmem:[#allocation4] sm:$0x1] %vm16_vm0, %v147_v55 }
  0x27   :  { %v146_v59 = vadd.f32 %v145_v57, %v144_v56 }
  0x29   :  { %v148_v60 = vadd.f32 %v146_v59, %v88_v58 }
  0x2b   :  { %150 = vst.msk [vmem:[#allocation4 + $0x1] sm:$0x1] %vm16_vm0, %v148_v60 }
  0x2c   :  { %176 = dma.vmem_to_hbm [thread:$0]  %s169_s19, 32, %s171_s22, [#allocation5], %s246_s1, %s246_s1, %s247_s17  }
  0x2d   :  { %240 = dma.done.wait [#allocation3], 32  }
  0x2e   :  { %241 = vsyncadd [#allocation3], 4294967264 }
  0x2f   :  { %242 = dma.done.wait [#allocation5], 32  }
  0x30   :  { %243 = vsyncadd [#allocation5], 4294967264 }
  0x31   :  { %185 = vsyncpa [#allocation3], 1 }
  0x32   :  { %186 = vsyncpa [#allocation5], 1 }

</bundles_post_ra>
